<compile_context>
chip_gen: v6e
topology: v6e:2x2x1
jax: 0.10.0
libtpu: 0.0.40
codegen_flags: <defaults>
</compile_context>

<pallas_src>
import jax
import jax.numpy as jnp
from jax.experimental import pallas as pl
from jax.experimental.pallas import tpu as pltpu

_LANES = 128
_SUBLANES = 8
_MAX_BLOCK_ROWS = 8192                      # 8192 x 128 x 4 B = 4 MiB per plane per buffer
_VMEM_LIMIT_BYTES = 48 * 1024 * 1024        # 32 MiB working set + headroom, < v7x 64 MiB


def _zrelu_kernel(re_ref, im_ref, o_re_ref, o_im_ref):
    re = re_ref[...]
    im = im_ref[...]
    keep = jnp.logical_and(re > 0, im > 0)          # first quadrant only
    zero = jnp.zeros((), re.dtype)
    o_re_ref[...] = jnp.where(keep, re, zero)
    o_im_ref[...] = jnp.where(keep, im, zero)


def _choose_block_rows(rows: int) -> int:
    """Largest tile <= _MAX_BLOCK_ROWS rows, with >= 2 grid steps when possible (v7x)."""
    n_blocks = max(2, pl.cdiv(rows, _MAX_BLOCK_ROWS))
    br = pl.cdiv(rows, n_blocks)
    br = ((br + _SUBLANES - 1) // _SUBLANES) * _SUBLANES   # sublane-aligned
    return max(br, _SUBLANES)


def _z_relu_xla(x: jax.Array) -> jax.Array:
    mask = jnp.logical_and(jnp.real(x) > 0, jnp.imag(x) > 0)
    return jnp.where(mask, x, jnp.zeros((), dtype=x.dtype))


@jax.jit
def z_relu(x: jax.Array) -> jax.Array:
    """zReLU on a complex array of arbitrary shape (e.g. NCHW)."""
    if not jnp.issubdtype(x.dtype, jnp.complexfloating):
        raise TypeError(f"zReLU expects a complex input, got {x.dtype}")
    if x.dtype != jnp.complex64:
        # TODO(synk): complex128 kernel path (f64 slabs); use fused XLA to avoid downcast.
        return _z_relu_xla(x)

    orig_shape = x.shape
    n = x.size

    re = jnp.real(x).reshape(-1)                    # float32 planes, no interleave
    im = jnp.imag(x).reshape(-1)

    rows = pl.cdiv(n, _LANES)
    rows = ((rows + _SUBLANES - 1) // _SUBLANES) * _SUBLANES
    pad = rows * _LANES - n
    if pad:                                         # usually 0 for NCHW sizes
        re = jnp.pad(re, (0, pad))
        im = jnp.pad(im, (0, pad))
    re_slab = re.reshape(rows, _LANES)
    im_slab = im.reshape(rows, _LANES)

    block_rows = _choose_block_rows(rows)
    grid = (pl.cdiv(rows, block_rows),)             # ragged last block handled by Pallas
    spec = pl.BlockSpec((block_rows, _LANES), lambda i: (i, 0))

    o_re, o_im = pl.pallas_call(
        _zrelu_kernel,
        out_shape=(
            jax.ShapeDtypeStruct((rows, _LANES), jnp.float32),
            jax.ShapeDtypeStruct((rows, _LANES), jnp.float32),
        ),
        grid=grid,
        in_specs=[spec, spec],
        out_specs=(spec, spec),
        compiler_params=pltpu.CompilerParams(
            dimension_semantics=("parallel",),
            vmem_limit_bytes=_VMEM_LIMIT_BYTES,
        ),
        cost_estimate=pl.CostEstimate(
            flops=5 * rows * _LANES,                # ~2.5 VPU ops per f32 element
            transcendentals=0,
            bytes_accessed=4 * rows * _LANES * 4,   # 2 planes read + 2 planes written
        ),
        input_output_aliases={0: 0, 1: 1},          # reuse the re/im HBM slabs
    )(re_slab, im_slab)

    o_re = o_re.reshape(-1)
    o_im = o_im.reshape(-1)
    if pad:
        o_re = o_re[:n]
        o_im = o_im[:n]
    return jax.lax.complex(o_re.reshape(orig_shape), o_im.reshape(orig_shape))


def z_relu_reference(x: jax.Array) -> jax.Array:
    mask = jnp.logical_and(jnp.real(x) > 0, jnp.imag(x) > 0)
    return jnp.where(mask, x, jnp.zeros((), dtype=x.dtype))


if __name__ == "__main__":
    key = jax.random.PRNGKey(0)
    k_re, k_im = jax.random.split(key)
    shape = (2, 4, 16, 16)  # NCHW
    x = (jax.random.normal(k_re, shape, dtype=jnp.float32)
         + 1j * jax.random.normal(k_im, shape, dtype=jnp.float32)).astype(jnp.complex64)

    out = jax.block_until_ready(z_relu(x))

    ref = z_relu_reference(x)
    assert out.shape == x.shape and out.dtype == x.dtype
    assert jnp.allclose(out, ref, atol=1e-6), "mismatch vs reference"

    print("KERNEL_OK")
</pallas_src>

<mosaic_0001>
module attributes {stable_mosaic.version = 11 : i64} {
  func.func @_zrelu_kernel(%arg0: i32, %arg1: memref<8x128xf32, #tpu.memory_space<vmem>>, %arg2: memref<8x128xf32, #tpu.memory_space<vmem>>, %arg3: memref<8x128xf32, #tpu.memory_space<vmem>>, %arg4: memref<8x128xf32, #tpu.memory_space<vmem>>) attributes {dimension_semantics = [#tpu.dimension_semantics<parallel>], iteration_bounds = array<i64: 2>, scalar_prefetch = 0 : i64, scratch_operands = 0 : i64, tpu.core_type = #tpu.core_type<tc>, window_params = [{transform_indices = @transform_0, window_bounds = array<i64: 8, 128>}, {transform_indices = @transform_1, window_bounds = array<i64: 8, 128>}, {transform_indices = @transform_2, window_bounds = array<i64: 8, 128>}, {transform_indices = @transform_3, window_bounds = array<i64: 8, 128>}]} {
    %c0 = arith.constant 0 : index
    %c0_0 = arith.constant 0 : index
    %0 = vector.load %arg1[%c0, %c0_0] : memref<8x128xf32, #tpu.memory_space<vmem>>, vector<8x128xf32>
    %c0_1 = arith.constant 0 : index
    %c0_2 = arith.constant 0 : index
    %1 = vector.load %arg2[%c0_1, %c0_2] : memref<8x128xf32, #tpu.memory_space<vmem>>, vector<8x128xf32>
    %cst = arith.constant 0.000000e+00 : f32
    %2 = vector.broadcast %cst : f32 to vector<8x128xf32>
    %3 = arith.cmpf ogt, %0, %2 : vector<8x128xf32>
    %cst_3 = arith.constant 0.000000e+00 : f32
    %4 = vector.broadcast %cst_3 : f32 to vector<8x128xf32>
    %5 = arith.cmpf ogt, %1, %4 : vector<8x128xf32>
    %6 = arith.andi %3, %5 : vector<8x128xi1>
    %cst_4 = arith.constant 0.000000e+00 : f32
    %7 = vector.broadcast %cst_4 : f32 to vector<8x128xf32>
    %8 = arith.select %6, %0, %7 : vector<8x128xi1>, vector<8x128xf32>
    %c0_5 = arith.constant 0 : index
    %c0_6 = arith.constant 0 : index
    %9 = vector.load %arg3[%c0_5, %c0_6] : memref<8x128xf32, #tpu.memory_space<vmem>>, vector<8x128xf32>
    tpu.vector_store %arg3[%c0_5, %c0_6], %8 {strides = array<i32>} : memref<8x128xf32, #tpu.memory_space<vmem>>, vector<8x128xf32>,
    %cst_7 = arith.constant 0.000000e+00 : f32
    %10 = vector.broadcast %cst_7 : f32 to vector<8x128xf32>
    %11 = arith.select %6, %1, %10 : vector<8x128xi1>, vector<8x128xf32>
    %c0_8 = arith.constant 0 : index
    %c0_9 = arith.constant 0 : index
    %12 = vector.load %arg4[%c0_8, %c0_9] : memref<8x128xf32, #tpu.memory_space<vmem>>, vector<8x128xf32>
    tpu.vector_store %arg4[%c0_8, %c0_9], %11 {strides = array<i32>} : memref<8x128xf32, #tpu.memory_space<vmem>>, vector<8x128xf32>,
    return
  }
  func.func @transform_0(%arg0: i32) -> (i32, i32) {
    %c0_i32 = arith.constant 0 : i32
    %c0_i32_0 = arith.constant 0 : i32
    return %arg0, %c0_i32 : i32, i32
  }
  func.func @transform_1(%arg0: i32) -> (i32, i32) {
    %c0_i32 = arith.constant 0 : i32
    %c0_i32_0 = arith.constant 0 : i32
    return %arg0, %c0_i32 : i32, i32
  }
  func.func @transform_2(%arg0: i32) -> (i32, i32) {
    %c0_i32 = arith.constant 0 : i32
    %c0_i32_0 = arith.constant 0 : i32
    return %arg0, %c0_i32 : i32, i32
  }
  func.func @transform_3(%arg0: i32) -> (i32, i32) {
    %c0_i32 = arith.constant 0 : i32
    %c0_i32_0 = arith.constant 0 : i32
    return %arg0, %c0_i32 : i32, i32
  }
}

</mosaic_0001>

<bundles_post_ra>
// kernel: custom-call.1
= control target key start
LH: loop header
LB: loop body
LE: loop exit
PB: predicated region body
PF: predicated region fallthrough
CT: control target
= control target key end

     0   :  { %s51_s0 = inlined_call_operand.hbm [shape: c64[2,4,16,16], index: 0, kind: input, shape index: {}]   ;;  %s52_s1 = inlined_call_operand.vmem [shape: f32[2,4,16,16], index: 1, kind: output, shape index: {}]  }
   0x1   :  { %s2_s8 = scalar_lea.hbm %s51_s0, 2048 }
   0x2   :  { %3 = vsyncpa [#allocation0], 0  ;;  %s4_s11 = sshll.u32 %s52_s1, 4  ;;  %s5_s11 = int_to_ptr.vmem [resolvable:$true] %s4_s11 }
   0x3   :  { %s20_s12 = scalar_lea.vmem %s5_s11, 2048  ;;  %p25_p1 = scmp.lt.s32.totalorder %s5_s11, %s5_s11 }
   0x4   :  { %p21_p0 = scmp.ne.s32.totalorder %s5_s11, %s20_s12  ;;  %p26_p2 = scmp.lt.s32.totalorder %s20_s12, %s20_s12 }
   0x6   :  { %p27_p3 = por %p26_p2, %p25_p1 }
   0x8   :  { %p28_p4 = pnand %p27_p3, %p21_p0 }
   0xa   :  { %31 = shalt.err (!%p28_p4)  }
   0xb   :  { %7 = dma.hbm_to_vmem [thread:$0]  %s2_s8, 2048, %s5_s11, [#allocation0] }
   0xc   :  { %33 = dma.done.wait [#allocation0], 2048  }
   0xd   :  { %34 = vsyncadd [#allocation0], 4294965248 }
   0xe   :  { %9 = vsyncpa [#allocation0], 1 }

// kernel: custom-call
= control target key start
LH: loop header
LB: loop body
LE: loop exit
PB: predicated region body
PF: predicated region fallthrough
CT: control target
= control target key end

     0   :  { %2 = vsyncpa [#allocation0], 0  ;;  %s47_s0 = inlined_call_operand.hbm [shape: c64[2,4,16,16], index: 0, kind: input, shape index: {}]   ;;  %s48_s1 = inlined_call_operand.vmem [shape: f32[2,4,16,16], index: 1, kind: output, shape index: {}]  }
   0x1   :  { %s3_s8 = sshll.u32 %s48_s1, 4  ;;  %s4_s8 = int_to_ptr.vmem [resolvable:$true] %s3_s8 }
   0x2   :  { %s17_s9 = scalar_lea.vmem %s4_s8, 2048  ;;  %p22_p1 = scmp.lt.s32.totalorder %s4_s8, %s4_s8 }
   0x3   :  { %p18_p0 = scmp.ne.s32.totalorder %s4_s8, %s17_s9  ;;  %p23_p2 = scmp.lt.s32.totalorder %s17_s9, %s17_s9 }
   0x5   :  { %p24_p3 = por %p23_p2, %p22_p1 }
   0x7   :  { %p25_p4 = pnand %p24_p3, %p18_p0 }
   0x9   :  { %28 = shalt.err (!%p25_p4)  }
   0xa   :  { %6 = dma.hbm_to_vmem [thread:$0]  %s47_s0, 2048, %s4_s8, [#allocation0] }
   0xb   :  { %29 = dma.done.wait [#allocation0], 2048  }
   0xc   :  { %30 = vsyncadd [#allocation0], 4294965248 }
   0xd   :  { %8 = vsyncpa [#allocation0], 1 }

// kernel: custom-call.2
= control target key start
LH: loop header
LB: loop body
LE: loop exit
PB: predicated region body
PF: predicated region fallthrough
CT: control target
= control target key end

     0   :  { %s92_s0 = inlined_call_operand.vmem [shape: f32[2,4,16,16], index: 0, kind: input, shape index: {}]   ;;  %s93_s1 = inlined_call_operand.vmem [shape: f32[2,4,16,16], index: 1, kind: input, shape index: {}]   ;;  %s94_s2 = inlined_call_operand.hbm [shape: c64[2,4,16,16], index: 2, kind: output, shape index: {}]  }
   0x1   :  { %s3_s11 = scalar_lea.hbm %s94_s2, 2048 }
   0x2   :  { %4 = vsyncpa [#allocation0], 0  ;;  %s5_s14 = sshll.u32 %s92_s0, 4  ;;  %s6_s14 = int_to_ptr.vmem [resolvable:$true] %s5_s14 }
   0x3   :  { %s18_s15 = scalar_lea.vmem %s6_s14, 2048  ;;  %p23_p1 = scmp.lt.s32.totalorder %s6_s14, %s6_s14 }
   0x4   :  { %p19_p0 = scmp.ne.s32.totalorder %s6_s14, %s18_s15  ;;  %p24_p2 = scmp.lt.s32.totalorder %s18_s15, %s18_s15 }
   0x6   :  { %p25_p3 = por %p24_p2, %p23_p1 }
   0x8   :  { %p26_p4 = pnand %p25_p3, %p19_p0 }
   0xa   :  { %29 = shalt.err (!%p26_p4)  }
   0xb   :  { %8 = dma.vmem_to_hbm [thread:$0]  %s6_s14, 2048, %s94_s2, [#allocation0] }
   0xc   :  { %61 = dma.done.wait [#allocation0], 2048  }
   0xd   :  { %62 = vsyncadd [#allocation0], 4294965248 }
   0xe   :  { %10 = vsyncpa [#allocation0], 1 }
   0xf   :  { %11 = vsyncpa [#allocation1], 0  ;;  %s12_s0 = sshll.u32 %s93_s1, 4  ;;  %s13_s0 = int_to_ptr.vmem [resolvable:$true] %s12_s0 }
  0x10   :  { %s38_s20 = scalar_lea.vmem %s13_s0, 2048  ;;  %p43_p6 = scmp.lt.s32.totalorder %s13_s0, %s13_s0 }
  0x11   :  { %p39_p5 = scmp.ne.s32.totalorder %s13_s0, %s38_s20  ;;  %p44_p7 = scmp.lt.s32.totalorder %s38_s20, %s38_s20 }
  0x13   :  { %p45_p8 = por %p44_p7, %p43_p6 }
  0x15   :  { %p46_p9 = pnand %p45_p8, %p39_p5 }
  0x17   :  { %49 = shalt.err (!%p46_p9)  }
  0x18   :  { %15 = dma.vmem_to_hbm [thread:$0]  %s13_s0, 2048, %s3_s11, [#allocation1] }
  0x19   :  { %63 = dma.done.wait [#allocation1], 2048  }
  0x1a   :  { %64 = vsyncadd [#allocation1], 4294965248 }
  0x1b   :  { %17 = vsyncpa [#allocation1], 1 }

// kernel: z_relu.1
= control target key start
LH: loop header
LB: loop body
LE: loop exit
PB: predicated region body
PF: predicated region fallthrough
CT: control target
= control target key end

     0   :  { %s322_s12 = smov 0   ;;  %s358_s0 = inlined_call_operand.vmem [shape: f32[16,128], index: 0, kind: input, shape index: {}, may-alias: {0,2}]   ;;  %s359_s1 = inlined_call_operand.vmem [shape: f32[16,128], index: 1, kind: input, shape index: {}, may-alias: {1,3}]   ;;  %s360_s2 = inlined_call_operand.vmem [shape: f32[16,128], index: 2, kind: output, shape index: {0}, may-alias: {0,2}]   ;;  %s361_s3 = inlined_call_operand.vmem [shape: f32[16,128], index: 3, kind: output, shape index: {1}, may-alias: {1,3}]  }
   0x1 LB: > { %s299_s13 = sadd.s32 4294967295, %s324_s12   ;;  %p303_p0 = scmp.ge.s32.totalorder %s324_s12, 1  ;;  %s324_s12 = sphi %s322_s12, %s14_s12  }
   0x2   : > { %p148_p1 = scmp.lt.s32.totalorder %s324_s12, 3 }
   0x4   : > { %p149_p2 = pnand %p303_p0, %p148_p1 }
   0x5   : > { %p178_p3 = scmp.lt.s32.totalorder (!%p149_p2), %s299_s13, 1 }
   0x6   : > { %152 = sbr.rel (%p149_p2) target bundleno = 20 (0x14), region = 28 }
   0xb   : > { %s363_s13 = smov (!%p178_p3, %s299_s13), 1 }
   0xc   : > { %s304_s14 = sshll.u32 %s363_s13, 3 }
   0xd   : > { %s181_s17 = scalar_lea.vmem %s358_s0, %s304_s14  ;;  %s185_s20 = scalar_lea.vmem %s359_s1, %s304_s14 }
   0xe   : > { %v194_v0 = vld [vmem:[%s181_s17] sm:$0xff]  ;;  %s189_s23 = scalar_lea.vmem %s360_s2, %s304_s14  ;;  %s193_s26 = scalar_lea.vmem %s361_s3, %s304_s14 }
   0xf   : > { %v195_v1 = vld [vmem:[%s185_s20] sm:$0xff]  ;;  %vm196_vm0 = vcmp.gt.f32.partialorder %v194_v0, 0.0 }
  0x10   : > { %vm197_vm1 = vcmp.gt.f32.partialorder %v195_v1, 0.0 }
  0x11   : > { %vm198_vm2 = vmand %vm196_vm0, %vm197_vm1 }
  0x12   : > { %v199_v2 = vsel %vm198_vm2, %v194_v0, 0.0  ;;  %v201_v3 = vsel %vm198_vm2, %v195_v1, 0.0 }
  0x13   : > { %200 = vst [vmem:[%s189_s23] sm:$0xff] %v199_v2  ;;  %202 = vst [vmem:[%s193_s26] sm:$0xff] %v201_v3 }
  0x14 PF: > { %s14_s12 = sadd.s32 1, %s324_s12  }
  0x15   : > { %p11_p4 = scmp.ge.s32.totalorder %s14_s12, 4  }
  0x17   :  { %13 = sbr.rel (!%p11_p4) target bundleno = 1 (0x1), region = 73 }

</bundles_post_ra>
